<compile_context>
chip_gen: v6e
topology: v6e:2x2x1
jax: 0.10.0
libtpu: 0.0.40
codegen_flags: <defaults>
</compile_context>

<pallas_src>
import jax
import jax.numpy as jnp
from jax import lax
from jax.experimental import pallas as pl
from jax.experimental.pallas import tpu as pltpu


def _round_up(n, m):
    return ((n + m - 1) // m) * m


def _make_mlp_kernel(chunk):
    def kernel(xt_ref, w1t_ref, b1t_ref, w2t_ref, b2t_ref, ot_ref):
        # xt_ref : (in_dim, TB)      batch on the 128-lane axis
        # w1t_ref: (hidden, in_dim)  VMEM-resident across grid steps (constant index_map)
        # b1t_ref: (hidden, 1)
        # w2t_ref: (out_dim, hidden)
        # b2t_ref: (out_dim, 1)
        # ot_ref : (out_dim, TB)
        in_dim = xt_ref.shape[0]
        hidden = w1t_ref.shape[0]
        out_dim = w2t_ref.shape[0]
        tb = xt_ref.shape[1]
        n_chunks = tb // chunk  # static

        w1t = w1t_ref[...]
        w2t = w2t_ref[...]
        # Hoist the lane broadcasts of the bias columns out of the chunk loop
        # (JAX does not CSE broadcast_in_dim; re-doing them per chunk is wasted XLU work).
        h0 = jnp.broadcast_to(b1t_ref[...], (hidden, chunk))
        yb = jnp.broadcast_to(b2t_ref[...], (out_dim, chunk))

        def body(c, carry):
            start = pl.multiple_of(c * chunk, chunk)
            xt = xt_ref[:, pl.ds(start, chunk)]          # (in_dim, chunk)

            # Layer 1: K = in_dim (=2) is tiny -> VPU broadcast-FMAs, skip the MXU.
            h = h0
            for k in range(in_dim):                      # static unroll (in_dim == 2)
                h = h + w1t[:, k:k + 1] * xt[k:k + 1, :]
            h = jnp.maximum(h, 0.0)                      # ReLU on the VPU

            # Layer 2: (out_dim, hidden) @ (hidden, chunk) on the MXU, f32 accumulation.
            y = jnp.dot(w2t, h, preferred_element_type=jnp.float32) + yb
            ot_ref[:, pl.ds(start, chunk)] = y.astype(ot_ref.dtype)
            return carry

        lax.fori_loop(0, n_chunks, body, 0, unroll=True)

    return kernel


def prepare_params(w1, b1, w2, b2):
    """One-time parameter layout prep — call once per model, NOT per forward.

    w1: (in_dim, hidden)  == PyTorch fc1.weight.T   b1: (hidden,)
    w2: (hidden, out_dim) == PyTorch fc2.weight.T   b2: (out_dim,)
    """
    w1t = jnp.asarray(w1, jnp.float32).T               # (hidden, in_dim)
    b1t = jnp.asarray(b1, jnp.float32).reshape(-1, 1)  # (hidden, 1)
    w2t = jnp.asarray(w2, jnp.float32).T               # (out_dim, hidden)
    b2t = jnp.asarray(b2, jnp.float32).reshape(-1, 1)  # (out_dim, 1)
    return w1t, b1t, w2t, b2t


def auto_park_forward(x, params, *, block_b=4096, batch_major_output=True):
    """Fused MLP forward.  x: (B, in_dim) f32 -> (B, out_dim) f32
    (or lane-dense (out_dim, B) if batch_major_output=False)."""
    w1t, b1t, w2t, b2t = params
    B, in_dim = x.shape
    hidden = w1t.shape[0]
    out_dim = w2t.shape[0]

    # Lane-dense batch tile: multiple of 128, capped at block_b.
    b128 = _round_up(max(B, 1), 128)
    tb = _round_up(min(block_b, b128), 128)          # defensive: block_b may not be 128-aligned
    # v7x: guarantee >= 2 grid steps when there are >= 256 rows so both TensorCores get
    # work under dimension_semantics=("parallel",).  No-op on single-TC v5e/v6e.
    if b128 >= 256:
        tb = min(tb, max(128, ((b128 // 2) // 128) * 128))

    # In-kernel strip-mining chunk: largest multiple of 128 (<= 1024 lanes) dividing tb.
    m = tb // 128
    chunk = 128
    for c in (8, 4, 2, 1):
        if m % c == 0:
            chunk = 128 * c
            break

    grid = (pl.cdiv(B, tb),)   # ragged last tile is clamped by Pallas; no explicit pad

    # Honest VMEM budget: double-buffered I/O tiles + per-chunk intermediates + slack.
    io_bytes = 2 * (in_dim + out_dim) * tb * 4
    scratch_bytes = (hidden + in_dim + out_dim) * chunk * 4
    vmem_limit = min(32 * 1024 * 1024,
                     max(8 * 1024 * 1024, 2 * (io_bytes + scratch_bytes)))

    xt = x.T   # (in_dim, B): batch mapped onto the 128-lane axis

    yt = pl.pallas_call(
        _make_mlp_kernel(chunk),
        out_shape=jax.ShapeDtypeStruct((out_dim, B), jnp.float32),
        grid=grid,
        in_specs=[
            pl.BlockSpec((in_dim, tb), lambda i: (0, i)),      # streamed batch tiles
            pl.BlockSpec((hidden, in_dim), lambda i: (0, 0)),  # resident weights
            pl.BlockSpec((hidden, 1), lambda i: (0, 0)),
            pl.BlockSpec((out_dim, hidden), lambda i: (0, 0)),
            pl.BlockSpec((out_dim, 1), lambda i: (0, 0)),
        ],
        out_specs=pl.BlockSpec((out_dim, tb), lambda i: (0, i)),
        compiler_params=pltpu.CompilerParams(
            dimension_semantics=("parallel",),   # batch tiles are independent
            vmem_limit_bytes=vmem_limit,
        ),
    )(xt, w1t, b1t, w2t, b2t)

    if batch_major_output:
        return yt.T          # (B, out_dim), matches the PyTorch module's layout
    return yt                # lane-dense (out_dim, B); skips one extra HBM pass


def init_params(key, in_dim=2, hidden_dim=20, out_dim=4):
    """PyTorch nn.Linear default init: U[-1/sqrt(fan_in), 1/sqrt(fan_in)]."""
    k1, k2, k3, k4 = jax.random.split(key, 4)
    bound1 = 1.0 / jnp.sqrt(jnp.float32(in_dim))
    bound2 = 1.0 / jnp.sqrt(jnp.float32(hidden_dim))
    # Weights stored as (in_features, out_features) == PyTorch weight.T
    w1 = jax.random.uniform(k1, (in_dim, hidden_dim), jnp.float32, -bound1, bound1)
    b1 = jax.random.uniform(k2, (hidden_dim,), jnp.float32, -bound1, bound1)
    w2 = jax.random.uniform(k3, (hidden_dim, out_dim), jnp.float32, -bound2, bound2)
    b2 = jax.random.uniform(k4, (out_dim,), jnp.float32, -bound2, bound2)
    return w1, b1, w2, b2


if __name__ == "__main__":
    key = jax.random.PRNGKey(0)
    k_in, k_param = jax.random.split(key)

    in_dim, hidden_dim, out_dim = 2, 20, 4
    batch = 200  # small, deliberately NOT a multiple of 128 -> exercises the ragged tile
    x = jax.random.normal(k_in, (batch, in_dim), jnp.float32)
    w1, b1, w2, b2 = init_params(k_param, in_dim, hidden_dim, out_dim)
    params = prepare_params(w1, b1, w2, b2)     # layout prep done once, not per call

    fwd = jax.jit(auto_park_forward)            # transposes fold into the jit program
    out = jax.block_until_ready(fwd(x, params))

    # Plain-JAX reference (same math as the PyTorch module), high precision.
    hp = jax.lax.Precision.HIGHEST
    ref = jnp.maximum(jnp.dot(x, w1, precision=hp) + b1, 0.0)
    ref = jnp.dot(ref, w2, precision=hp) + b2

    assert out.shape == (batch, out_dim)
    err = float(jnp.max(jnp.abs(out - ref)))
    assert jnp.allclose(out, ref, atol=1e-4, rtol=1e-4), err

    print("KERNEL_OK")
</pallas_src>

<mosaic_0001>
module attributes {stable_mosaic.version = 11 : i64} {
  func.func @kernel(%arg0: i32, %arg1: memref<2x128xf32, #tpu.memory_space<vmem>>, %arg2: memref<20x2xf32, #tpu.memory_space<vmem>>, %arg3: memref<20x1xf32, #tpu.memory_space<vmem>>, %arg4: memref<4x20xf32, #tpu.memory_space<vmem>>, %arg5: memref<4x1xf32, #tpu.memory_space<vmem>>, %arg6: memref<4x128xf32, #tpu.memory_space<vmem>>) attributes {dimension_semantics = [#tpu.dimension_semantics<parallel>], iteration_bounds = array<i64: 2>, scalar_prefetch = 0 : i64, scratch_operands = 0 : i64, tpu.core_type = #tpu.core_type<tc>, window_params = [{transform_indices = @transform_0, window_bounds = array<i64: 2, 128>}, {pipeline_mode = #tpu.pipeline_mode<synchronous>, transform_indices = @transform_1, window_bounds = array<i64: 20, 2>}, {pipeline_mode = #tpu.pipeline_mode<synchronous>, transform_indices = @transform_2, window_bounds = array<i64: 20, 1>}, {pipeline_mode = #tpu.pipeline_mode<synchronous>, transform_indices = @transform_3, window_bounds = array<i64: 4, 20>}, {pipeline_mode = #tpu.pipeline_mode<synchronous>, transform_indices = @transform_4, window_bounds = array<i64: 4, 1>}, {transform_indices = @transform_5, window_bounds = array<i64: 4, 128>}]} {
    %c0 = arith.constant 0 : index
    %c0_0 = arith.constant 0 : index
    %0 = vector.load %arg2[%c0, %c0_0] : memref<20x2xf32, #tpu.memory_space<vmem>>, vector<20x2xf32>
    %c0_1 = arith.constant 0 : index
    %c0_2 = arith.constant 0 : index
    %1 = vector.load %arg4[%c0_1, %c0_2] : memref<4x20xf32, #tpu.memory_space<vmem>>, vector<4x20xf32>
    %c0_3 = arith.constant 0 : index
    %c0_4 = arith.constant 0 : index
    %2 = vector.load %arg3[%c0_3, %c0_4] : memref<20x1xf32, #tpu.memory_space<vmem>>, vector<20x1xf32>
    %3 = vector.shape_cast %2 : vector<20x1xf32> to vector<20x1xf32>
    %4 = vector.broadcast %3 : vector<20x1xf32> to vector<20x128xf32>
    %c0_5 = arith.constant 0 : index
    %c0_6 = arith.constant 0 : index
    %5 = vector.load %arg5[%c0_5, %c0_6] : memref<4x1xf32, #tpu.memory_space<vmem>>, vector<4x1xf32>
    %6 = vector.shape_cast %5 : vector<4x1xf32> to vector<4x1xf32>
    %7 = vector.broadcast %6 : vector<4x1xf32> to vector<4x128xf32>
    %c0_i32 = arith.constant 0 : i32
    %c128_i32 = arith.constant 128 : i32
    %8 = arith.muli %c0_i32, %c128_i32 : i32
    %9 = tpu.assume_multiple %8, 128 : i32
    %c0_7 = arith.constant 0 : index
    %10 = arith.index_cast %9 : i32 to index
    %11 = vector.load %arg1[%c0_7, %10] : memref<2x128xf32, #tpu.memory_space<vmem>>, vector<2x128xf32>
    %12 = vector.extract_strided_slice %0 {offsets = [0, 0], sizes = [20, 1], strides = [1, 1]} : vector<20x2xf32> to vector<20x1xf32>
    %13 = vector.extract_strided_slice %11 {offsets = [0, 0], sizes = [1, 128], strides = [1, 1]} : vector<2x128xf32> to vector<1x128xf32>
    %14 = vector.broadcast %12 : vector<20x1xf32> to vector<20x128xf32>
    %15 = vector.broadcast %13 : vector<1x128xf32> to vector<20x128xf32>
    %16 = arith.mulf %14, %15 : vector<20x128xf32>
    %17 = arith.addf %4, %16 : vector<20x128xf32>
    %18 = vector.extract_strided_slice %0 {offsets = [0, 1], sizes = [20, 1], strides = [1, 1]} : vector<20x2xf32> to vector<20x1xf32>
    %19 = vector.extract_strided_slice %11 {offsets = [1, 0], sizes = [1, 128], strides = [1, 1]} : vector<2x128xf32> to vector<1x128xf32>
    %20 = vector.broadcast %18 : vector<20x1xf32> to vector<20x128xf32>
    %21 = vector.broadcast %19 : vector<1x128xf32> to vector<20x128xf32>
    %22 = arith.mulf %20, %21 : vector<20x128xf32>
    %23 = arith.addf %17, %22 : vector<20x128xf32>
    %cst = arith.constant 0.000000e+00 : f32
    %24 = vector.broadcast %cst : f32 to vector<20x128xf32>
    %25 = arith.maximumf %23, %24 : vector<20x128xf32>
    %cst_8 = arith.constant dense<0.000000e+00> : vector<4x128xf32>
    %26 = tpu.matmul %1, %25, %cst_8 {dimension_numbers = #tpu.dot_dimension_numbers<[1], [0], [0], [1], [0, 0, 1, 1], [], []>} : vector<4x20xf32>, vector<20x128xf32>, vector<4x128xf32> -> vector<4x128xf32>
    %27 = arith.addf %26, %7 : vector<4x128xf32>
    %c0_9 = arith.constant 0 : index
    %28 = arith.index_cast %9 : i32 to index
    %29 = vector.load %arg6[%c0_9, %28] : memref<4x128xf32, #tpu.memory_space<vmem>>, vector<4x128xf32>
    tpu.vector_store %arg6[%c0_9, %28], %27 {strides = array<i32>} : memref<4x128xf32, #tpu.memory_space<vmem>>, vector<4x128xf32>,
    %c1_i32 = arith.constant 1 : i32
    return
  }
  func.func @transform_0(%arg0: i32) -> (i32, i32) {
    %c0_i32 = arith.constant 0 : i32
    %c0_i32_0 = arith.constant 0 : i32
    return %c0_i32, %arg0 : i32, i32
  }
  func.func @transform_1(%arg0: i32) -> (i32, i32) {
    %c0_i32 = arith.constant 0 : i32
    %c0_i32_0 = arith.constant 0 : i32
    %c0_i32_1 = arith.constant 0 : i32
    return %c0_i32, %c0_i32_0 : i32, i32
  }
  func.func @transform_2(%arg0: i32) -> (i32, i32) {
    %c0_i32 = arith.constant 0 : i32
    %c0_i32_0 = arith.constant 0 : i32
    %c0_i32_1 = arith.constant 0 : i32
    return %c0_i32, %c0_i32_0 : i32, i32
  }
  func.func @transform_3(%arg0: i32) -> (i32, i32) {
    %c0_i32 = arith.constant 0 : i32
    %c0_i32_0 = arith.constant 0 : i32
    %c0_i32_1 = arith.constant 0 : i32
    return %c0_i32, %c0_i32_0 : i32, i32
  }
  func.func @transform_4(%arg0: i32) -> (i32, i32) {
    %c0_i32 = arith.constant 0 : i32
    %c0_i32_0 = arith.constant 0 : i32
    %c0_i32_1 = arith.constant 0 : i32
    return %c0_i32, %c0_i32_0 : i32, i32
  }
  func.func @transform_5(%arg0: i32) -> (i32, i32) {
    %c0_i32 = arith.constant 0 : i32
    %c0_i32_0 = arith.constant 0 : i32
    return %c0_i32, %arg0 : i32, i32
  }
}

</mosaic_0001>

<bundles_post_ra>
// kernel: auto_park_forward.1
= control target key start
LH: loop header
LB: loop body
LE: loop exit
PB: predicated region body
PF: predicated region fallthrough
CT: control target
= control target key end

     0   :  { %10 = vsyncpa [#allocation3], 0  ;;  %s741_s0 = inlined_call_operand.vmem [shape: f32[2,200], index: 0, kind: input, shape index: {}]   ;;  %s742_s1 = inlined_call_operand.vmem [shape: f32[20,2], index: 1, kind: input, shape index: {}]   ;;  %s743_s2 = inlined_call_operand.vmem [shape: f32[20,1], index: 2, kind: input, shape index: {}]   ;;  %s744_s3 = inlined_call_operand.vmem [shape: f32[4,20], index: 3, kind: input, shape index: {}]   ;;  %s745_s4 = inlined_call_operand.vmem [shape: f32[4,1], index: 4, kind: input, shape index: {}]   ;;  %s746_s5 = inlined_call_operand.hbm [shape: f32[4,200], index: 5, kind: output, shape index: {}]  }
   0x1   :  { %12 = vsyncpa [#allocation3 + $0x1], 0  ;;  %s624_s18 = smov 0   ;;  %s626_s19 = smov 0  }
   0x2   :  { %s628_s20 = smov 0   ;;  %s630_s21 = smov 0  }
   0x3 LB: > { %s645_s22 = sadd.s32 4294967295, %s587_s21   ;;  %s451_s23 = sadd.s32 4294967294, %s587_s21   ;;  %s587_s21 = sphi %s630_s21, %s752_s21   ;;  %s583_s20 = sphi %s628_s20, %s751_s20   ;;  %s579_s19 = sphi %s626_s19, %s750_s19   ;;  %s575_s18 = sphi %s624_s18, %s749_s18  }
   0x4   : > { %s649_s24 = sadd.s32 1, %s587_s21   ;;  %s135_s25 = sadd.s32 1, %s583_s20 }
   0x5   : > { %s132_s26 = ssub.s32 %s587_s21, %s649_s24  ;;  %p145_p0 = scmp.ne.s32.totalorder %s583_s20, %s579_s19 }
   0x6   : > { %p133_p1 = scmp.eq.s32.totalorder %s132_s26, 0  ;;  %p146_p2 = scmp.eq.s32.totalorder %s645_s22, 1 }
   0x7   : > { %p151_p3 = scmp.ne.s32.totalorder %s579_s19, %s575_s18  ;;  %p152_p4 = scmp.eq.s32.totalorder %s451_s23, 1 }
   0x8   : > { %s660_s27 = scalar_select %p133_p1, %s583_s20, %s135_s25  }
   0x9   : > { %p662_p5 = por %p146_p2, %p145_p0  ;;  %p666_p6 = por %p152_p4, %p151_p3 }
   0xa   : > { %p454_p7 = scmp.ge.s32.totalorder %s587_s21, 1  ;;  %p189_p8 = scmp.lt.s32.totalorder %s587_s21, 3 }
   0xc   : > { %p190_p9 = pnand %p454_p7, %p189_p8 }
   0xd   : > { %p216_p10 = scmp.lt.s32.totalorder (!%p190_p9), %s645_s22, 1  ;;  %s213_s10 = sand.u32 (!%p190_p9), 1, %s579_s19  }
   0xe   : > { %193 = sbr.rel (%p190_p9) target bundleno = 379 (0x17b), region = 40  ;;  %s455_s11 = sshll.u32 (!%p190_p9), %s213_s10, 2 }
   0xf   : > { %s460_s12 = sshll.u32 (!%p190_p9), %s645_s22, 6  ;;  %s215_s13 = scalar_lea.vmem (!%p190_p9), [#allocation2], %s455_s11 }
  0x10   : > { %s392_s14 = sshll.u32 (!%p190_p9), %s215_s13, 4  ;;  %s706_s17 = scalar_lea.hbm (!%p190_p9), %s746_s5, %s460_s12  ;;  %s393_s14 = int_to_ptr.vmem [resolvable:$true] %s392_s14 }
  0x11   : > { %s379_s23 = scalar_lea.sflag (!%p190_p9), [#allocation3], %s213_s10 }
  0x13   : > { %v222_v0 = vld [vmem:[%s742_s1 + $0x10] sm:$0xf]  ;;  %v221_v1 = vld [vmem:[%s742_s1 + $0x8] sm:$0xff]  ;;  %v589_v2 = vmov 0   ;;  %v590_v4 = vmov 1   ;;  %v591_v6 = vmov 0.0   ;;  %v264_v10 = vlaneseq }
  0x14   : > { %520 = vset.pattern.permute.xlu1 %v589_v2  ;;  %519 = vset.pattern.permute.xlu0 %v589_v2  ;;  %v226_v3 = vld [vmem:[%s743_s2 + $0x10] sm:$0xf]  ;;  %v225_v5 = vld [vmem:[%s743_s2 + $0x8] sm:$0xff]  ;;  %v220_v7 = vld [vmem:[%s742_s1] sm:$0xff]  ;;  %vm592_vm0 = vmmov 0   ;;  %s217_s25 = scalar_select %p216_p10, %s645_s22, 1 }
  0x15   : > { %261 = vperm.xlu0 %519, %v222_v0   ;;  %256 = vperm.xlu1 %520, %v221_v1   ;;  %v224_v8 = vld [vmem:[%s743_s2] sm:$0xff]  ;;  %v265_v11 = vshrl.u32 %v264_v10, 7  ;;  %vm303_vm1 = vcmask 1043456   ;;  %vm299_vm2 = vcmask 162816  }
  0x16   : > { %467 = vmatprep.subr.mxu0 %v591_v6  ;;  %473 = vmatprep.mubr.msk.f32.mxu0 %vm592_vm0, %v591_v6  ;;  %v242_v9 = vld [vmem:[%s745_s4] sm:$0xf]  ;;  %s456_s26 = sshll.u32 %s217_s25, 1  ;;  %s527_s25 = scalar_lea.vmem %s393_s14, 64 }
  0x17   : > { %s219_s7 = scalar_lea.vmem %s741_s0, %s456_s26  ;;  %v266_v12 = vsub.s32 0, %v265_v11  ;;  %v288_v14 = vsub.s32 1, %v265_v11  ;;  %v223_v41 = vld [vmem:[%s744_s3] sm:$0xf]  ;;  %p528_p11 = scmp.ne.s32.totalorder %s393_s14, %s527_s25 }
  0x18   : > { %v248_v13 = vld [vmem:[%s219_s7] sm:$0x3]  ;;  %s593_s26 = smov [#allocation2]  }
  0x19   : > { %239 = vperm.xlu0 %519, %v226_v3   ;;  %521 = vset.pattern.permute.xlu1 %v590_v4  ;;  %v267_v15 = vrot.slane %v248_v13, %v266_v12  ;;  %v289_v19 = vrot.slane %v248_v13, %v288_v14  ;;  %p529_p12 = pnand %p528_p11, %p662_p5  ;;  %s531_s22 = sshll.u32 %s593_s26, 4  ;;  %s532_s22 = int_to_ptr.vmem [resolvable:$false] %s531_s22 }
  0x1a   : > { %283 = vperm.xlu1 %521, %v222_v0   ;;  %s533_s30 = scalar_lea.vmem %s532_s22, 128  ;;  %p534_p0 = scmp.lt.s32.totalorder %s393_s14, %s532_s22 }
  0x1b   : > { %p530_p13 = pneg %p529_p12  ;;  %p535_p1 = scmp.lt.s32.totalorder %s533_s30, %s527_s25 }
  0x1d   : > { %234 = vperm.xlu0 %519, %v225_v5   ;;  %p536_p2 = por %p535_p1, %p534_p0 }
  0x1e   : > { %522 = vset.pattern.permute.xlu1 %v589_v2 }
  0x1f   : > { %251 = vperm.xlu1 %522, %v220_v7   ;;  %p537_p3 = pnand %p536_p2, %p530_p13 }
  0x21   : > { %523 = vset.pattern.permute.xlu0 %v590_v4 }
  0x22   : > { %279 = vperm.xlu0 %523, %v221_v1  }
  0x23   : > { %229 = vperm.xlu1 %522, %v224_v8  }
  0x26   : > { %525 = vset.pattern.permute.xlu0 %v589_v2 }
  0x27   : > { %524 = vset.pattern.permute.xlu1 %v590_v4  ;;  %245 = vperm.xlu0 %525, %v242_v9  }
  0x28   : > { %275 = vperm.xlu1 %524, %v220_v7  }
  0x2b   : > { %526 = vset.pattern.permute.xlu0 %v590_v4 }
  0x90   : > { %v262_v16 = vpop.permute.xlu0 %261  ;;  %v257_v17 = vpop.permute.xlu1 %256 }
  0x91   : > { %v270_v18 = vmul.f32 %v267_v15, %v262_v16  ;;  %v269_v28 = vmul.f32 %v267_v15, %v257_v17 }
  0x94   : > { %v240_v20 = vpop.permute.xlu0 %239 }
  0x95   : > { %v273_v21 = vadd.f32 %v270_v18, %v240_v20  ;;  %v284_v22 = vpop.permute.xlu1 %283 }
  0x96   : > { %v292_v23 = vmul.f32 %v289_v19, %v284_v22 }
  0x98   : > { %v295_v24 = vadd.f32 %v292_v23, %v273_v21  ;;  %v235_v25 = vpop.permute.xlu0 %234 }
  0x99   : > { %v272_v30 = vadd.f32 %v269_v28, %v235_v25 }
  0x9a   : > { %v298_v26 = vmax.f32 %v295_v24, 0.0  ;;  %v252_v27 = vpop.permute.xlu1 %251 }
  0x9b   : > { %v268_v34 = vmul.f32 %v267_v15, %v252_v27 }
  0x9c   : > { %468 = vmatpush3.msk.msra.mxu0 %vm303_vm1, %v298_v26 }
  0x9d   : > { %v280_v29 = vpop.permute.xlu0 %279  ;;  %469 = vmatprep.subr.mxu0 %v591_v6 }
  0x9e   : > { %v291_v31 = vmul.f32 %v289_v19, %v280_v29  ;;  %v230_v32 = vpop.permute.xlu1 %229 }
  0x9f   : > { %v271_v37 = vadd.f32 %v268_v34, %v230_v32 }
  0xa0   : > { %v294_v33 = vadd.f32 %v291_v31, %v272_v30 }
  0xa2   : > { %v297_v35 = vmax.f32 %v294_v33, 0.0  ;;  %v246_v42 = vpop.permute.xlu0 %245 }
  0xa3   : > { %v276_v36 = vpop.permute.xlu1 %275 }
  0xa4   : > { %v290_v38 = vmul.f32 %v289_v19, %v276_v36  ;;  %470 = vmatpush3.msra.mxu0 %v297_v35 }
  0xa5   : > { %471 = vmatprep.subr.mxu0 %v591_v6 }
  0xa6   : > { %v293_v39 = vadd.f32 %v290_v38, %v271_v37 }
  0xa8   : > { %v296_v40 = vmax.f32 %v293_v39, 0.0 }
  0xaa   : > { %472 = vmatpush3.msra.mxu0 %v296_v40 }
  0xab   : > { %474 = vmatmul.mubr.msk.f32.vlgmr.msra.gmra.mxu0 %vm299_vm2, %v223_v41 }
 0x16b   : > { %v373_v43 = vpop.f32.mrf.mxu0 }
 0x16c   : > { %v374_v44 = vadd.f32 %v373_v43, %v246_v42 }
 0x16d   : > { %v475_v45 = vpop.f32.mrf.mxu0 }
 0x16e   : > { %377 = vst [vmem:[%s215_s13] sm:$0xf] %v374_v44 }
 0x16f   : > { %540 = shalt.err (!%p537_p3)
}
 0x170   : > { %s541_s6 = scalar_lea.hbm %s706_s17, 64  ;;  %s545_s9 = scalar_lea.hbm %s746_s5, 128 }
 0x171   : > { %p542_p4 = scmp.ne.s32.totalorder %s706_s17, %s541_s6  ;;  %p546_p9 = scmp.lt.s32.totalorder %s706_s17, %s746_s5 }
 0x172   : > { %p547_p10 = scmp.lt.s32.totalorder %s545_s9, %s541_s6 }
 0x173   : > { %p543_p7 = pnand %p542_p4, %p662_p5 }
 0x174   : > { %p548_p11 = por %p547_p10, %p546_p9 }
 0x175   : > { %p544_p8 = pneg %p543_p7 }
 0x177   : > { %p549_p12 = pnand %p548_p11, %p544_p8 }
 0x179   : > { %552 = shalt.err (!%p549_p12)
}
 0x17a   : > { %476 = dma.vmem_to_hbm [thread:$0]  (%p662_p5), %s393_s14, 64, %s706_s17, %s379_s23  }
 0x17b PF: > { %p482_p13 = scmp.ge.s32.totalorder %s587_s21, 2  ;;  %s404_s12 = sand.u32 1, %s575_s18  }
 0x17c   : > { %s405_s13 = scalar_lea.sflag [#allocation3], %s404_s12 }
 0x17d   : > { %p479_p0 = pnand %p482_p13, %p666_p6 }
 0x17f   : > { %p480_p1 = pneg %p479_p0 }
 0x181   : > { %570 = dma.done.wait (%p480_p1), %s405_s13, 64  }
 0x182   : > { %572 = vsyncadd (%p480_p1), %s405_s13, 4294967232  ;;  %p15_p2 = scmp.ge.s32.totalorder %s649_s24, 4   ;;  %s749_s18 = smov %s579_s19 }
 0x183   : > { %s750_s19 = smov %s583_s20  ;;  %s751_s20 = smov %s660_s27 }
 0x184   : > { %s752_s21 = smov %s649_s24  ;;  %17 = sbr.rel (!%p15_p2) target bundleno = 3 (0x3), region = 75 }
 0x189   :  { %410 = vsyncpa [#allocation3], 1 }
 0x18a   :  { %412 = vsyncpa [#allocation3 + $0x1], 1 }

</bundles_post_ra>
